<compile_context>
chip_gen: v7x
topology: tpu7x:2x2x1
jax: 0.10.0
libtpu: 0.0.40
codegen_flags: <defaults>
</compile_context>

<pallas_src>
import functools

import jax
import jax.numpy as jnp
from jax.experimental import pallas as pl
from jax.experimental.pallas import tpu as pltpu


def _round_up(x, m):
    return int(pl.cdiv(x, m) * m)


def _choose_batch_tile(B, *, max_tile=512, min_steps=4):
    # Enough steps to keep the tile <= max_tile ...
    steps = pl.cdiv(B, max_tile)
    # ... and at least `min_steps` steps (2 per TC on v7x) while keeping
    # >= 8 rows per step; minimizes padding for awkward B.
    steps = max(steps, min(min_steps, pl.cdiv(B, 8)))
    return _round_up(pl.cdiv(B, steps), 8)


def _nfm_kernel(x_ref, rcat_ref, w1_ref, b1_ref, w2_ref, b2_ref, blin_ref,
                out_ref, *, K, O):
    x = x_ref[...]                                      # (TB, F) f32

    # Single fused MXU pass: [x | x*x] @ [[E|Wlin, 0],[0, E*E]] -> (TB, 2K+O)
    lhs = jnp.concatenate([x, x * x], axis=-1)          # (TB, 2F)
    xw = jnp.dot(lhs, rcat_ref[...], preferred_element_type=jnp.float32)

    sum_emb = xw[:, :K]                                 # x @ E
    lin_out = xw[:, K:K + O] + blin_ref[...]            # x @ Wlin + b_lin
    sum_sq = xw[:, K + O:]                              # (x*x) @ (E*E)

    inter_vec = 0.5 * (sum_emb * sum_emb - sum_sq)      # (TB, K)

    # Interaction MLP: Dropout(eval)=identity -> Linear -> ReLU -> Linear.
    h = jnp.dot(inter_vec, w1_ref[...], preferred_element_type=jnp.float32)
    h = jnp.maximum(h + b1_ref[...], 0.0)
    inter_out = jnp.dot(h, w2_ref[...], preferred_element_type=jnp.float32)
    inter_out = inter_out + b2_ref[...]

    # Store only the two 8-lane pieces; remaining slab lanes are never read
    # (wrapper slices [:, :2*O] and forms out = lin + inter there).
    out_ref[:, 0:2 * O] = jnp.concatenate([lin_out, inter_out], axis=-1)


def nfm_forward(x, emb, w1, b1, w2, b2, wlin, blin, *, batch_tile=512):
    B, F = x.shape
    K = emb.shape[1]
    O = w2.shape[1]

    # Grid-invariant prep hoisted out of the kernel (weights are constants):
    # block-diagonal fused RHS  [[E | Wlin, 0], [0, E*E]]  of shape (2F, 2K+O).
    top = jnp.concatenate([emb, wlin, jnp.zeros((F, K), jnp.float32)], axis=1)
    bot = jnp.concatenate([jnp.zeros((F, K + O), jnp.float32), emb * emb], axis=1)
    rcat = jnp.concatenate([top, bot], axis=0)           # (2F, 2K + O)

    TB = _choose_batch_tile(B, max_tile=batch_tile)
    B_pad = _round_up(B, TB)
    if B_pad != B:
        x = jnp.pad(x, ((0, B_pad - B), (0, 0)))
    grid = B_pad // TB

    # Lane-dense output slab (>= 128 lanes, multiple of 128); only the first
    # 2*O lanes are written/read.
    out_lanes = max(128, _round_up(2 * O, 128))

    kernel = functools.partial(_nfm_kernel, K=K, O=O)

    # Replicated parameters resolve to block index 0 every step, so they stay
    # resident in VMEM across the batch grid; only x and the output tile move.
    const = lambda shape: pl.BlockSpec(shape, lambda i: tuple(0 for _ in shape))
    in_specs = [
        pl.BlockSpec((TB, F), lambda i: (i, 0)),   # x (batch-tiled)
        const((2 * F, 2 * K + O)),                 # block-diag [E|Wlin ; E*E]
        const((K, K)),                             # W1
        const((1, K)),                             # b1
        const((K, O)),                             # W2
        const((1, O)),                             # b2
        const((1, O)),                             # b_lin
    ]
    out_spec = pl.BlockSpec((TB, out_lanes), lambda i: (i, 0))

    slab = pl.pallas_call(
        kernel,
        out_shape=jax.ShapeDtypeStruct((B_pad, out_lanes), jnp.float32),
        grid_spec=pltpu.PrefetchScalarGridSpec(
            num_scalar_prefetch=0,
            grid=(grid,),
            in_specs=in_specs,
            out_specs=out_spec,
        ),
        compiler_params=pltpu.CompilerParams(
            dimension_semantics=("parallel",),      # batch axis shards across TCs
        ),
    )(x, rcat, w1, b1, w2, b2, blin)

    lin_out = slab[:B, 0:O]
    inter_out = slab[:B, O:2 * O]
    out = lin_out + inter_out                       # trivial fused XLA add
    return out, lin_out, inter_out


def reference_forward(x, emb, w1, b1, w2, b2, wlin, blin):
    weighted = x[:, :, None] * emb[None, :, :]          # (B, F, K)
    sum_emb = weighted.sum(axis=1)
    sum_sq = (weighted ** 2).sum(axis=1)
    inter_vec = 0.5 * (sum_emb ** 2 - sum_sq)
    h = jnp.maximum(inter_vec @ w1 + b1, 0.0)
    inter_out = h @ w2 + b2
    lin_out = x @ wlin + blin
    return lin_out + inter_out, lin_out, inter_out


if __name__ == "__main__":
    # Small shapes consistent with the module's forward; B chosen so the batch
    # grid has 4 steps (2 per TensorCore on v7x) with the adaptive tile.
    B = 256                  # batch
    F = 64                   # num_sae_features
    K = 32                   # embedding_dim
    O = 8                    # output_dim

    key = jax.random.PRNGKey(0)
    kx, ke, k1, k2, k3, k4, k5, k6 = jax.random.split(key, 8)

    x = jax.random.normal(kx, (B, F), dtype=jnp.float32)

    # Deterministic parameter init (Embedding ~ N(0,1); Linear ~ U(-1/sqrt(in), 1/sqrt(in))).
    emb = jax.random.normal(ke, (F, K), dtype=jnp.float32)
    w1 = jax.random.uniform(k1, (K, K), jnp.float32, -1.0 / K ** 0.5, 1.0 / K ** 0.5)
    b1 = jax.random.uniform(k2, (1, K), jnp.float32, -1.0 / K ** 0.5, 1.0 / K ** 0.5)
    w2 = jax.random.uniform(k3, (K, O), jnp.float32, -1.0 / K ** 0.5, 1.0 / K ** 0.5)
    b2 = jax.random.uniform(k4, (1, O), jnp.float32, -1.0 / K ** 0.5, 1.0 / K ** 0.5)
    wlin = jax.random.uniform(k5, (F, O), jnp.float32, -1.0 / F ** 0.5, 1.0 / F ** 0.5)
    blin = jax.random.uniform(k6, (1, O), jnp.float32, -1.0 / F ** 0.5, 1.0 / F ** 0.5)

    out, lin_out, inter_out = nfm_forward(x, emb, w1, b1, w2, b2, wlin, blin)
    jax.block_until_ready(out)
    jax.block_until_ready(lin_out)
    jax.block_until_ready(inter_out)

    ref_out, ref_lin, ref_inter = reference_forward(x, emb, w1, b1, w2, b2, wlin, blin)
    assert jnp.allclose(out, ref_out, atol=1e-3, rtol=1e-3)
    assert jnp.allclose(lin_out, ref_lin, atol=1e-3, rtol=1e-3)
    assert jnp.allclose(inter_out, ref_inter, atol=1e-3, rtol=1e-3)

    print("KERNEL_OK")
</pallas_src>

<mosaic_0001>
module attributes {stable_mosaic.version = 11 : i64} {
  func.func @_nfm_kernel(%arg0: i32, %arg1: memref<64x64xf32, #tpu.memory_space<vmem>>, %arg2: memref<128x72xf32, #tpu.memory_space<vmem>>, %arg3: memref<32x32xf32, #tpu.memory_space<vmem>>, %arg4: memref<1x32xf32, #tpu.memory_space<vmem>>, %arg5: memref<32x8xf32, #tpu.memory_space<vmem>>, %arg6: memref<1x8xf32, #tpu.memory_space<vmem>>, %arg7: memref<1x8xf32, #tpu.memory_space<vmem>>, %arg8: memref<64x128xf32, #tpu.memory_space<vmem>>) attributes {dimension_semantics = [#tpu.dimension_semantics<parallel>], iteration_bounds = array<i64: 4>, scalar_prefetch = 0 : i64, scratch_operands = 0 : i64, tpu.core_type = #tpu.core_type<tc>, window_params = [{transform_indices = @transform_0, window_bounds = array<i64: 64, 64>}, {pipeline_mode = #tpu.pipeline_mode<synchronous>, transform_indices = @transform_1, window_bounds = array<i64: 128, 72>}, {pipeline_mode = #tpu.pipeline_mode<synchronous>, transform_indices = @transform_2, window_bounds = array<i64: 32, 32>}, {pipeline_mode = #tpu.pipeline_mode<synchronous>, transform_indices = @transform_3, window_bounds = array<i64: 1, 32>}, {pipeline_mode = #tpu.pipeline_mode<synchronous>, transform_indices = @transform_4, window_bounds = array<i64: 32, 8>}, {pipeline_mode = #tpu.pipeline_mode<synchronous>, transform_indices = @transform_5, window_bounds = array<i64: 1, 8>}, {pipeline_mode = #tpu.pipeline_mode<synchronous>, transform_indices = @transform_6, window_bounds = array<i64: 1, 8>}, {transform_indices = @transform_7, window_bounds = array<i64: 64, 128>}]} {
    %c0 = arith.constant 0 : index
    %c0_0 = arith.constant 0 : index
    %0 = vector.load %arg1[%c0, %c0_0] : memref<64x64xf32, #tpu.memory_space<vmem>>, vector<64x64xf32>
    %1 = arith.mulf %0, %0 : vector<64x64xf32>
    %2 = tpu.concatenate %0, %1 in 1 : vector<64x64xf32>, vector<64x64xf32> -> vector<64x128xf32>
    %c0_1 = arith.constant 0 : index
    %c0_2 = arith.constant 0 : index
    %3 = vector.load %arg2[%c0_1, %c0_2] : memref<128x72xf32, #tpu.memory_space<vmem>>, vector<128x72xf32>
    %cst = arith.constant dense<0.000000e+00> : vector<64x72xf32>
    %4 = tpu.matmul %2, %3, %cst {dimension_numbers = #tpu.dot_dimension_numbers<[1], [0], [0], [1], [0, 0, 1, 1], [], []>} : vector<64x128xf32>, vector<128x72xf32>, vector<64x72xf32> -> vector<64x72xf32>
    %5 = vector.extract_strided_slice %4 {offsets = [0, 0], sizes = [64, 32], strides = [1, 1]} : vector<64x72xf32> to vector<64x32xf32>
    %6 = vector.extract_strided_slice %4 {offsets = [0, 32], sizes = [64, 8], strides = [1, 1]} : vector<64x72xf32> to vector<64x8xf32>
    %c0_3 = arith.constant 0 : index
    %c0_4 = arith.constant 0 : index
    %7 = vector.load %arg7[%c0_3, %c0_4] : memref<1x8xf32, #tpu.memory_space<vmem>>, vector<1x8xf32>
    %8 = vector.broadcast %7 : vector<1x8xf32> to vector<64x8xf32>
    %9 = arith.addf %6, %8 : vector<64x8xf32>
    %10 = vector.extract_strided_slice %4 {offsets = [0, 40], sizes = [64, 32], strides = [1, 1]} : vector<64x72xf32> to vector<64x32xf32>
    %11 = arith.mulf %5, %5 : vector<64x32xf32>
    %12 = arith.subf %11, %10 : vector<64x32xf32>
    %cst_5 = arith.constant 5.000000e-01 : f32
    %13 = vector.broadcast %cst_5 : f32 to vector<64x32xf32>
    %14 = arith.mulf %13, %12 : vector<64x32xf32>
    %c0_6 = arith.constant 0 : index
    %c0_7 = arith.constant 0 : index
    %15 = vector.load %arg3[%c0_6, %c0_7] : memref<32x32xf32, #tpu.memory_space<vmem>>, vector<32x32xf32>
    %cst_8 = arith.constant dense<0.000000e+00> : vector<64x32xf32>
    %16 = tpu.matmul %14, %15, %cst_8 {dimension_numbers = #tpu.dot_dimension_numbers<[1], [0], [0], [1], [0, 0, 1, 1], [], []>} : vector<64x32xf32>, vector<32x32xf32>, vector<64x32xf32> -> vector<64x32xf32>
    %c0_9 = arith.constant 0 : index
    %c0_10 = arith.constant 0 : index
    %17 = vector.load %arg4[%c0_9, %c0_10] : memref<1x32xf32, #tpu.memory_space<vmem>>, vector<1x32xf32>
    %18 = vector.broadcast %17 : vector<1x32xf32> to vector<64x32xf32>
    %19 = arith.addf %16, %18 : vector<64x32xf32>
    %cst_11 = arith.constant 0.000000e+00 : f32
    %20 = vector.broadcast %cst_11 : f32 to vector<64x32xf32>
    %21 = arith.maximumf %19, %20 : vector<64x32xf32>
    %c0_12 = arith.constant 0 : index
    %c0_13 = arith.constant 0 : index
    %22 = vector.load %arg5[%c0_12, %c0_13] : memref<32x8xf32, #tpu.memory_space<vmem>>, vector<32x8xf32>
    %cst_14 = arith.constant dense<0.000000e+00> : vector<64x8xf32>
    %23 = tpu.matmul %21, %22, %cst_14 {dimension_numbers = #tpu.dot_dimension_numbers<[1], [0], [0], [1], [0, 0, 1, 1], [], []>} : vector<64x32xf32>, vector<32x8xf32>, vector<64x8xf32> -> vector<64x8xf32>
    %c0_15 = arith.constant 0 : index
    %c0_16 = arith.constant 0 : index
    %24 = vector.load %arg6[%c0_15, %c0_16] : memref<1x8xf32, #tpu.memory_space<vmem>>, vector<1x8xf32>
    %25 = vector.broadcast %24 : vector<1x8xf32> to vector<64x8xf32>
    %26 = arith.addf %23, %25 : vector<64x8xf32>
    %27 = tpu.concatenate %9, %26 in 1 : vector<64x8xf32>, vector<64x8xf32> -> vector<64x16xf32>
    %c0_17 = arith.constant 0 : index
    %c0_18 = arith.constant 0 : index
    %28 = vector.load %arg8[%c0_17, %c0_18] : memref<64x128xf32, #tpu.memory_space<vmem>>, vector<64x16xf32>
    tpu.vector_store %arg8[%c0_17, %c0_18], %27 {strides = array<i32>} : memref<64x128xf32, #tpu.memory_space<vmem>>, vector<64x16xf32>,
    return
  }
  func.func @transform_0(%arg0: i32) -> (i32, i32) {
    %c0_i32 = arith.constant 0 : i32
    %c0_i32_0 = arith.constant 0 : i32
    return %arg0, %c0_i32 : i32, i32
  }
  func.func @transform_1(%arg0: i32) -> (i32, i32) {
    %c0_i32 = arith.constant 0 : i32
    %c0_i32_0 = arith.constant 0 : i32
    %c0_i32_1 = arith.constant 0 : i32
    return %c0_i32, %c0_i32_0 : i32, i32
  }
  func.func @transform_2(%arg0: i32) -> (i32, i32) {
    %c0_i32 = arith.constant 0 : i32
    %c0_i32_0 = arith.constant 0 : i32
    %c0_i32_1 = arith.constant 0 : i32
    return %c0_i32, %c0_i32_0 : i32, i32
  }
  func.func @transform_3(%arg0: i32) -> (i32, i32) {
    %c0_i32 = arith.constant 0 : i32
    %c0_i32_0 = arith.constant 0 : i32
    %c0_i32_1 = arith.constant 0 : i32
    return %c0_i32, %c0_i32_0 : i32, i32
  }
  func.func @transform_4(%arg0: i32) -> (i32, i32) {
    %c0_i32 = arith.constant 0 : i32
    %c0_i32_0 = arith.constant 0 : i32
    %c0_i32_1 = arith.constant 0 : i32
    return %c0_i32, %c0_i32_0 : i32, i32
  }
  func.func @transform_5(%arg0: i32) -> (i32, i32) {
    %c0_i32 = arith.constant 0 : i32
    %c0_i32_0 = arith.constant 0 : i32
    %c0_i32_1 = arith.constant 0 : i32
    return %c0_i32, %c0_i32_0 : i32, i32
  }
  func.func @transform_6(%arg0: i32) -> (i32, i32) {
    %c0_i32 = arith.constant 0 : i32
    %c0_i32_0 = arith.constant 0 : i32
    %c0_i32_1 = arith.constant 0 : i32
    return %c0_i32, %c0_i32_0 : i32, i32
  }
  func.func @transform_7(%arg0: i32) -> (i32, i32) {
    %c0_i32 = arith.constant 0 : i32
    %c0_i32_0 = arith.constant 0 : i32
    return %arg0, %c0_i32 : i32, i32
  }
}

</mosaic_0001>

<bundles_post_ra>
// kernel: tpu_custom_call.1
= control target key start
LH: loop header
LB: loop body
LE: loop exit
PB: predicated region body
PF: predicated region fallthrough
CT: control target
= control target key end

     0   :  { %12 = vsyncpa [#allocation3], 0  ;;  %s1668_s0 = inlined_call_operand.vmem [shape: f32[256,64], index: 0, kind: input, shape index: {}]   ;;  %s1669_s1 = inlined_call_operand.vmem [shape: f32[128,72], index: 1, kind: input, shape index: {}]   ;;  %s1670_s2 = inlined_call_operand.vmem [shape: f32[32,32], index: 2, kind: input, shape index: {}]   ;;  %s1671_s3 = inlined_call_operand.vmem [shape: f32[1,32], index: 3, kind: input, shape index: {}]   ;;  %s1672_s4 = inlined_call_operand.vmem [shape: f32[32,8], index: 4, kind: input, shape index: {}]   ;;  %s1673_s5 = inlined_call_operand.vmem [shape: f32[1,8], index: 5, kind: input, shape index: {}]   ;;  %s1674_s6 = inlined_call_operand.vmem [shape: f32[1,8], index: 6, kind: input, shape index: {}]   ;;  %s1675_s7 = inlined_call_operand.hbm [shape: f32[256,128], index: 7, kind: output, shape index: {}]  }
   0x1   :  { %14 = vsyncpa [#allocation3 + $0x1], 0  ;;  %s1366_s24 = smov 0   ;;  %s1368_s25 = smov 0  }
   0x2   :  { %s1370_s26 = smov 0   ;;  %s1372_s27 = smov 0  }
   0x3 LB: > { %s1387_s28 = sadd.s32 4294967295, %s1317_s27   ;;  %s978_s29 = sadd.s32 4294967294, %s1317_s27   ;;  %s1317_s27 = sphi %s1372_s27, %s1681_s27   ;;  %s1313_s26 = sphi %s1370_s26, %s1680_s26   ;;  %s1309_s25 = sphi %s1368_s25, %s1679_s25   ;;  %s1305_s24 = sphi %s1366_s24, %s1678_s24  }
   0x4   : > { %s1391_s30 = sadd.s32 1, %s1317_s27   ;;  %s179_s8 = sadd.s32 1, %s1313_s26 }
   0x5   : > { %s176_s9 = ssub.s32 %s1317_s27, %s1391_s30  ;;  %p189_p0 = scmp.ne.s32.totalorder %s1313_s26, %s1309_s25 }
   0x6   : > { %p177_p1 = scmp.eq.s32.totalorder %s176_s9, 0  ;;  %p190_p2 = scmp.eq.s32.totalorder %s1387_s28, 3 }
   0x7   : > { %p195_p3 = scmp.ne.s32.totalorder %s1309_s25, %s1305_s24  ;;  %p196_p4 = scmp.eq.s32.totalorder %s978_s29, 3 }
   0x8   : > { %s1402_s10 = scalar_select %p177_p1, %s1313_s26, %s179_s8  }
   0x9   : > { %p1404_p5 = por %p190_p2, %p189_p0  ;;  %p1408_p6 = por %p196_p4, %p195_p3 }
   0xa   : > { %p981_p7 = scmp.ge.s32.totalorder %s1317_s27, 1  ;;  %p241_p8 = scmp.lt.s32.totalorder %s1317_s27, 5 }
   0xc   : > { %p242_p9 = pnand %p981_p7, %p241_p8 }
   0xd   : > { %s983_s13 = sshll.u32 (!%p242_p9), %s1387_s28, 3  ;;  %v337_v0 = vld [vmem:[%s1669_s1] sm:$0xff] (!%p242_p9)  ;;  %v338_v1 = vld [vmem:[%s1669_s1 + $0x8] sm:$0xff] (!%p242_p9)  ;;  %v339_v2 = vld [vmem:[%s1669_s1 + $0x10] sm:$0xff] (!%p242_p9)  ;;  %s1319_s29 = smov (!%p242_p9), 64   ;;  %vm328_vm0 = vcmask (!%p242_p9), 523264  }
   0xe   : > { %245 = sbr.rel (%p242_p9) target bundleno = 1057 (0x421), region = 48  ;;  %p274_p10 = scmp.lt.s32.totalorder (!%p242_p9), %s983_s13, 31  ;;  %v1142_v3 = vpack.c.bf16 (!%p242_p9), %v338_v1, %v337_v0  ;;  %v340_v4 = vld [vmem:[%s1669_s1 + $0x18] sm:$0xff] (!%p242_p9)  ;;  %v341_v6 = vld [vmem:[%s1669_s1 + $0x20] sm:$0xff] (!%p242_p9)  ;;  %v342_v7 = vld [vmem:[%s1669_s1 + $0x28] sm:$0xff] (!%p242_p9)  ;;  %vm542_vm1 = vcmask (!%p242_p9), 261120  }
   0xf   : > { %v1146_v5 = vpack.c.bf16 (!%p242_p9), %v340_v4, %v339_v2  ;;  %v1150_v8 = vpack.c.bf16 (!%p242_p9), %v342_v7, %v341_v6  ;;  %v343_v9 = vld [vmem:[%s1669_s1 + $0x30] sm:$0xff] (!%p242_p9)  ;;  %v344_v10 = vld [vmem:[%s1669_s1 + $0x38] sm:$0xff] (!%p242_p9)  ;;  %v345_v29 = vld [vmem:[%s1669_s1 + $0x40] sm:$0xff] (!%p242_p9)  ;;  %s1320_s18 = smov (!%p242_p9), 88   ;;  %s270_s21 = sand.u32 (!%p242_p9), 1, %s1309_s25   ;;  %vm884_vm2 = vcmask (!%p242_p9), 64512  }
  0x10   : > { %1143 = vmatprep.subr.bf16.mxu0 (!%p242_p9), %v1142_v3  ;;  %v1154_v25 = vpack.c.bf16 (!%p242_p9), %v344_v10, %v343_v9  ;;  %v346_v30 = vld [vmem:[%s1669_s1 + $0x48] sm:$0xff] (!%p242_p9)  ;;  %v347_v35 = vld [vmem:[%s1669_s1 + $0x50] sm:$0xff] (!%p242_p9)  ;;  %v348_v36 = vld [vmem:[%s1669_s1 + $0x58] sm:$0xff] (!%p242_p9)  ;;  %s982_s22 = sshll.u32 (!%p242_p9), %s270_s21, 6  ;;  %vm893_vm3 = vcmask (!%p242_p9), 130048   ;;  %s1324_s17 = smov (!%p242_p9), [#allocation2]  }
  0x11   : > { %1145 = vmatpush3.bf16.msra.mxu0 (!%p242_p9), %v1142_v3  ;;  %v1158_v34 = vpack.c.bf16 (!%p242_p9), %v346_v30, %v345_v29  ;;  %v1162_v37 = vpack.c.bf16 (!%p242_p9), %v348_v36, %v347_v35  ;;  %v349_v38 = vld [vmem:[%s1669_s1 + $0x60] sm:$0xff] (!%p242_p9)  ;;  %v350_v39 = vld [vmem:[%s1669_s1 + $0x68] sm:$0xff] (!%p242_p9)  ;;  %v351_v41 = vld [vmem:[%s1669_s1 + $0x70] sm:$0xff] (!%p242_p9)  ;;  %s272_s23 = scalar_lea.vmem (!%p242_p9), [#allocation2], %s982_s22 }
  0x12   : > { %1147 = vmatprep.subr.bf16.mxu0 (!%p242_p9), %v1146_v5  ;;  %v1166_v40 = vpack.c.bf16 (!%p242_p9), %v350_v39, %v349_v38  ;;  %v352_v42 = vld [vmem:[%s1669_s1 + $0x78] sm:$0xff] (!%p242_p9)  ;;  %v531_v0 = vld [vmem:[%s1670_s2] sm:$0xff] (!%p242_p9)  ;;  %v532_v1 = vld [vmem:[%s1670_s2 + $0x8] sm:$0xff] (!%p242_p9)  ;;  %s916_s8 = sshll.u32 (!%p242_p9), %s272_s23, 4  ;;  %s1619_s8 = int_to_ptr.vmem [resolvable:$true] %s916_s8 }
  0x13   : > { %v1170_v43 = vpack.c.bf16 (!%p242_p9), %v352_v42, %v351_v41  ;;  %v1174_v2 = vpack.c.bf16 (!%p242_p9), %v532_v1, %v531_v0  ;;  %v533_v3 = vld [vmem:[%s1670_s2 + $0x10] sm:$0xff] (!%p242_p9)  ;;  %v534_v4 = vld [vmem:[%s1670_s2 + $0x18] sm:$0xff] (!%p242_p9) }
  0x15   : > { %s1683_s13 = smov (!%p274_p10, %s983_s13), 31  ;;  %1149 = vmatpush3.bf16.msra.mxu0 %v1146_v5  ;;  %1175 = vmatprep.subr.bf16.mxu1 %v1174_v2  ;;  %v1178_v5 = vpack.c.bf16 %v534_v4, %v533_v3 }
  0x16   : > { %s984_s9 = sshll.u32 %s1683_s13, 3  ;;  %1151 = vmatprep.subr.bf16.mxu0 %v1150_v8  ;;  %1177 = vmatpush3.bf16.msra.mxu1 %v1174_v2  ;;  %s1321_s13 = smov 32  }
  0x17   : > { %s277_s16 = scalar_lea.vmem %s1668_s0, %s984_s9  ;;  %1179 = vmatprep.subr.bf16.mxu1 %v1178_v5 }
  0x18   : > { %v280_v11 = vld [vmem:[%s277_s16] sm:$0xff]  ;;  %v281_v12 = vld [vmem:[%s277_s16 + $0x8] sm:$0xff]  ;;  %v1442_v13 = vld [vmem:[%s277_s16 + $0x10] sm:$0xff] }
  0x19   : > { %v288_v14 = vmul.f32 %v280_v11, %v280_v11  ;;  %v289_v15 = vmul.f32 %v281_v12, %v281_v12  ;;  %v1444_v16 = vld [vmem:[%s277_s16 + $0x18] sm:$0xff]  ;;  %v290_v17 = vmul.f32 %v1442_v13, %v1442_v13  ;;  %v1448_v18 = vld [vmem:[%s277_s16 + $0x20] sm:$0xff]  ;;  %v1450_v19 = vld [vmem:[%s277_s16 + $0x28] sm:$0xff]  ;;  %1153 = vmatpush3.bf16.msra.mxu0 %v1150_v8 }
  0x1a   : > { %v291_v20 = vmul.f32 %v1444_v16, %v1444_v16  ;;  %v292_v21 = vmul.f32 %v1448_v18, %v1448_v18  ;;  %v293_v22 = vmul.f32 %v1450_v19, %v1450_v19  ;;  %v1458_v23 = vld [vmem:[%s277_s16 + $0x30] sm:$0xff]  ;;  %v1460_v24 = vld [vmem:[%s277_s16 + $0x38] sm:$0xff]  ;;  %1155 = vmatprep.subr.bf16.mxu0 %v1154_v25  ;;  %1181 = vmatpush3.bf16.msra.mxu1 %v1178_v5  ;;  %s1322_s16 = smov 96  }
  0x1b   : > { %v1235_v26 = vpack.i.bf16 %v289_v15, %v288_v14  ;;  %v294_v27 = vmul.f32 %v1458_v23, %v1458_v23  ;;  %v295_v28 = vmul.f32 %v1460_v24, %v1460_v24  ;;  %v985_v14 = vld [vmem:[%s1674_s6] ss:$0 sm:$0xff] }
  0x1c   : > { %v1245_v31 = vpack.i.bf16 %v293_v22, %v292_v21  ;;  %v1240_v32 = vpack.i.bf16 %v291_v20, %v290_v17 }
  0x1d   : > { %1236 = vrot.lane.b32.xlu0 %v1235_v26, %s1319_s29  ;;  %v1250_v33 = vpack.i.bf16 %v295_v28, %v294_v27  ;;  %1157 = vmatpush3.bf16.msra.mxu0 %v1154_v25 }
  0x1e   : > { %1246 = vrot.lane.b32.xlu1 %v1245_v31, %s1319_s29  ;;  %1159 = vmatprep.subr.bf16.mxu0 %v1158_v34 }
  0x21   : > { %1241 = vrot.lane.b32.xlu0 %v1240_v32, %s1319_s29  ;;  %1161 = vmatpush3.bf16.msra.mxu0 %v1158_v34 }
  0x22   : > { %1251 = vrot.lane.b32.xlu1 %v1250_v33, %s1319_s29  ;;  %1163 = vmatprep.subr.bf16.mxu0 %v1162_v37  ;;  %s1009_s29 = sshll.u32 %s1387_s28, 10  ;;  %s1626_s28 = scalar_lea.sflag [#allocation3], %s270_s21 }
  0x23   : > { %s1616_s15 = scalar_lea.hbm %s1675_s7, %s1009_s29 }
  0x25   : > { %1165 = vmatpush3.bf16.msra.mxu0 %v1162_v37 }
  0x26   : > { %1167 = vmatprep.subr.bf16.mxu0 %v1166_v40 }
  0x29   : > { %1169 = vmatpush3.bf16.msra.mxu0 %v1166_v40 }
  0x2a   : > { %1171 = vmatprep.subr.bf16.mxu0 %v1170_v43 }
  0x2d   : > { %1173 = vmatpush3.bf16.msra.mxu0 %v1170_v43 }
  0x8f   : > { %v1237_v44 = vpop.permute.xlu0 %1236 }
  0x90   : > { %v1239_v45 = vunpack.i.h.bf16 %v1237_v44  ;;  %v1238_v46 = vunpack.i.l.bf16 %v1237_v44  ;;  %v1247_v47 = vpop.permute.xlu1 %1246 }
  0x91   : > { %v1248_v50 = vunpack.i.l.bf16 %v1247_v47  ;;  %v1249_v55 = vunpack.i.h.bf16 %v1247_v47 }
  0x92   : > { %v329_v48 = vsel %vm328_vm0, %v280_v11, %v1238_v46  ;;  %v330_v49 = vsel %vm328_vm0, %v281_v12, %v1239_v45 }
  0x93   : > { %v1242_v51 = vpop.permute.xlu0 %1241  ;;  %1090 = vmatprep.mubr.f32.mxu0 %v329_v48  ;;  %v333_v59 = vsel %vm328_vm0, %v1448_v18, %v1248_v50  ;;  %v334_v61 = vsel %vm328_vm0, %v1450_v19, %v1249_v55  ;;  %v680_v50 = vld [vmem:[%s1672_s4] sm:$0xff] }
  0x94   : > { %v1244_v52 = vunpack.i.h.bf16 %v1242_v51  ;;  %v1243_v53 = vunpack.i.l.bf16 %v1242_v51  ;;  %1091 = vmatmul.mubr.f32.vlgmr.msra.gmra.mrb[0].mxu0 %v330_v49  ;;  %v1252_v54 = vpop.permute.xlu1 %1251  ;;  %v681_v51 = vld [vmem:[%s1672_s4 + $0x8] sm:$0xff] }
  0x95   : > { %v1253_v58 = vunpack.i.l.bf16 %v1252_v54  ;;  %v1254_v60 = vunpack.i.h.bf16 %v1252_v54  ;;  %v1182_v54 = vpack.c.bf16 %v681_v51, %v680_v50 }
  0x96   : > { %v331_v56 = vsel %vm328_vm0, %v1442_v13, %v1243_v53  ;;  %v332_v57 = vsel %vm328_vm0, %v1444_v16, %v1244_v52  ;;  %v682_v52 = vld [vmem:[%s1672_s4 + $0x10] sm:$0xff]  ;;  %v683_v53 = vld [vmem:[%s1672_s4 + $0x18] sm:$0xff] }
  0x97   : > { %1093 = vmatprep.mubr.f32.mxu0 %v331_v56  ;;  %v335_v62 = vsel %vm328_vm0, %v1458_v23, %v1253_v58  ;;  %v336_v63 = vsel %vm328_vm0, %v1460_v24, %v1254_v60  ;;  %v1186_v55 = vpack.c.bf16 %v683_v53, %v682_v52  ;;  %1183 = vmatprep.subr.bf16.mxu1 %v1182_v54 }
  0x98   : > { %1094 = vmatmul.mubr.f32.gmra.mrb[2].mxu0 %v332_v57 }
  0x99   : > { %1096 = vmatprep.mubr.f32.mxu0 %v333_v59 }
  0x9c   : > { %1097 = vmatmul.mubr.f32.gmra.mrb[4].mxu0 %v334_v61 }
  0x9d   : > { %1099 = vmatprep.mubr.f32.mxu0 %v335_v62  ;;  %v986_v62 = vld [vmem:[%s1671_s3] ss:$0 sm:$0xff] }
  0xa0   : > { %1100 = vmatmul.mubr.f32.gmra.mrb[6].mxu0 %v336_v63 }
 0x167   : > { %v1092_v6 = vpop.f32.mrb[0].mxu0 }
 0x168   : > { %493 = vrot.lane.b32.xlu1 %v1092_v6, %s1320_s18  ;;  %v419_v7 = vpop.f32.mrb[1].mxu0  ;;  %v476_v15 = vmul.f32 %v1092_v6, %v1092_v6 }
 0x169   : > { %491 = vrot.lane.b32.xlu0 %v419_v7, %s1320_s18  ;;  %v475_v17 = vmul.f32 %v419_v7, %v419_v7 }
 0x16b   : > { %v1516_v8 = vpop.f32.mrb[2].mxu0 }
 0x16c   : > { %497 = vrot.lane.b32.xlu1 %v1516_v8, %s1320_s18  ;;  %v1519_v9 = vpop.f32.mrb[3].mxu0  ;;  %v478_v21 = vmul.f32 %v1516_v8, %v1516_v8 }
 0x16d   : > { %495 = vrot.lane.b32.xlu0 %v1519_v9, %s1320_s18  ;;  %v477_v24 = vmul.f32 %v1519_v9, %v1519_v9 }
 0x16f   : > { %v1522_v10 = vpop.f32.mrb[4].mxu0 }
 0x170   : > { %501 = vrot.lane.b32.xlu1 %v1522_v10, %s1320_s18  ;;  %v1525_v11 = vpop.f32.mrb[5].mxu0  ;;  %v480_v29 = vmul.f32 %v1522_v10, %v1522_v10 }
 0x171   : > { %499 = vrot.lane.b32.xlu0 %v1525_v11, %s1320_s18  ;;  %v479_v32 = vmul.f32 %v1525_v11, %v1525_v11 }
 0x173   : > { %v1528_v12 = vpop.f32.mrb[6].mxu0 }
 0x174   : > { %505 = vrot.lane.b32.xlu1 %v1528_v12, %s1320_s18  ;;  %v1531_v13 = vpop.f32.mrb[7].mxu0  ;;  %v482_v37 = vmul.f32 %v1528_v12, %v1528_v12 }
 0x175   : > { %503 = vrot.lane.b32.xlu0 %v1531_v13, %s1320_s18  ;;  %v481_v38 = vmul.f32 %v1531_v13, %v1531_v13  ;;  %s1259_s18 = sshll.u32 %s1324_s17, 4  ;;  %s1260_s18 = int_to_ptr.vmem [resolvable:$false] %s1259_s18 }
 0x176   : > { %s1261_s19 = scalar_lea.vmem %s1260_s18, 2048  ;;  %p1262_p0 = scmp.lt.s32.totalorder %s1619_s8, %s1260_s18 }
 0x179   : > { %464 = vrot.lane.b32.xlu0 %v985_v14, %s1321_s13  ;;  %s1323_s13 = smov 8  }
 0x1da   : > { %v494_v16 = vpop.permute.xlu1 %493 }
 0x1db   : > { %v516_v18 = vsub.f32 %v476_v15, %v494_v16  ;;  %v492_v19 = vpop.permute.xlu0 %491 }
 0x1dc   : > { %v515_v20 = vsub.f32 %v475_v17, %v492_v19 }
 0x1dd   : > { %v524_v25 = vmul.f32 0.5, %v516_v18 }
 0x1de   : > { %v523_v22 = vmul.f32 0.5, %v515_v20  ;;  %v498_v23 = vpop.permute.xlu1 %497 }
 0x1df   : > { %v518_v26 = vsub.f32 %v478_v21, %v498_v23  ;;  %v496_v27 = vpop.permute.xlu0 %495  ;;  %v995_v23 = vld [vmem:[%s1673_s5] ss:$0 sm:$0xff] }
 0x1e0   : > { %v517_v28 = vsub.f32 %v477_v24, %v496_v27  ;;  %1110 = vmatprep.mubr.msk.f32.mxu1 %vm542_vm1, %v523_v22 }
 0x1e1   : > { %1111 = vmatmul.mubr.msk.f32.vlgmr.msra.gmra.mrb[0].mxu1 %vm542_vm1, %v524_v25  ;;  %v526_v33 = vmul.f32 0.5, %v518_v26 }
 0x1e2   : > { %v525_v30 = vmul.f32 0.5, %v517_v28  ;;  %v502_v31 = vpop.permute.xlu1 %501  ;;  %1185 = vmatpush3.bf16.msra.mxu1 %v1182_v54 }
 0x1e3   : > { %v520_v34 = vsub.f32 %v480_v29, %v502_v31  ;;  %v500_v35 = vpop.permute.xlu0 %499  ;;  %1187 = vmatprep.subr.bf16.mxu1 %v1186_v55 }
 0x1e4   : > { %v519_v36 = vsub.f32 %v479_v32, %v500_v35  ;;  %1113 = vmatprep.mubr.msk.f32.mxu1 %vm542_vm1, %v525_v30 }
 0x1e5   : > { %1114 = vmatmul.mubr.msk.f32.gmra.mrb[2].mxu1 %vm542_vm1, %v526_v33  ;;  %v528_v41 = vmul.f32 0.5, %v520_v34 }
 0x1e6   : > { %v527_v39 = vmul.f32 0.5, %v519_v36  ;;  %v506_v40 = vpop.permute.xlu1 %505  ;;  %1189 = vmatpush3.bf16.msra.mxu1 %v1186_v55 }
 0x1e7   : > { %v522_v42 = vsub.f32 %v482_v37, %v506_v40  ;;  %v504_v43 = vpop.permute.xlu0 %503 }
 0x1e8   : > { %v521_v44 = vsub.f32 %v481_v38, %v504_v43  ;;  %1116 = vmatprep.mubr.msk.f32.mxu1 %vm542_vm1, %v527_v39 }
 0x1e9   : > { %1117 = vmatmul.mubr.msk.f32.gmra.mrb[4].mxu1 %vm542_vm1, %v528_v41  ;;  %v530_v46 = vmul.f32 0.5, %v522_v42 }
 0x1ea   : > { %v529_v45 = vmul.f32 0.5, %v521_v44 }
 0x1eb   : > { %v465_v47 = vpop.permute.xlu0 %464 }
 0x1ec   : > { %1119 = vmatprep.mubr.msk.f32.mxu1 %vm542_vm1, %v529_v45  ;;  %v468_v48 = vadd.f32 %v1092_v6, %v465_v47  ;;  %v467_v49 = vadd.f32 %v465_v47, %v419_v7  ;;  %v470_v56 = vadd.f32 %v1516_v8, %v465_v47  ;;  %v469_v57 = vadd.f32 %v465_v47, %v1519_v9 }
 0x1ed   : > { %1120 = vmatmul.mubr.msk.f32.gmra.mrb[6].mxu1 %vm542_vm1, %v530_v46  ;;  %v472_v58 = vadd.f32 %v1522_v10, %v465_v47  ;;  %v471_v59 = vadd.f32 %v465_v47, %v1525_v11  ;;  %v474_v60 = vadd.f32 %v1528_v12, %v465_v47  ;;  %v473_v61 = vadd.f32 %v465_v47, %v1531_v13 }
 0x1ee   : > { %830 = vrot.lane.b32.xlu0 %v468_v48, %s1322_s16  ;;  %828 = vrot.lane.b32.xlu1 %v467_v49, %s1322_s16 }
 0x1f2   : > { %834 = vrot.lane.b32.xlu0 %v470_v56, %s1322_s16  ;;  %832 = vrot.lane.b32.xlu1 %v469_v57, %s1322_s16 }
 0x1f6   : > { %838 = vrot.lane.b32.xlu0 %v472_v58, %s1322_s16  ;;  %836 = vrot.lane.b32.xlu1 %v471_v59, %s1322_s16 }
 0x1fa   : > { %842 = vrot.lane.b32.xlu0 %v474_v60, %s1322_s16  ;;  %840 = vrot.lane.b32.xlu1 %v473_v61, %s1322_s16  ;;  %s1255_s16 = scalar_lea.vmem %s1619_s8, 1024 }
 0x1fb   : > { %p1256_p11 = scmp.ne.s32.totalorder %s1619_s8, %s1255_s16  ;;  %p1263_p1 = scmp.lt.s32.totalorder %s1261_s19, %s1255_s16 }
 0x1fd   : > { %p1257_p12 = pnand %p1256_p11, %p1404_p5  ;;  %p1264_p2 = por %p1263_p1, %p1262_p0 }
 0x1ff   : > { %p1258_p13 = pneg %p1257_p12 }
 0x201   : > { %p1265_p3 = pnand %p1264_p2, %p1258_p13 }
 0x260   : > { %v831_v40 = vpop.permute.xlu0 %830  ;;  %v829_v41 = vpop.permute.xlu1 %828 }
 0x264   : > { %v835_v42 = vpop.permute.xlu0 %834  ;;  %v833_v43 = vpop.permute.xlu1 %832 }
 0x268   : > { %v839_v44 = vpop.permute.xlu0 %838  ;;  %v837_v45 = vpop.permute.xlu1 %836 }
 0x26c   : > { %v843_v46 = vpop.permute.xlu0 %842  ;;  %v841_v47 = vpop.permute.xlu1 %840 }
 0x2b4   : > { %v1112_v63 = vpop.f32.mrb[0].mxu1 }
 0x2b5   : > { %v639_v0 = vadd.f32 %v1112_v63, %v986_v62  ;;  %v633_v1 = vpop.f32.mrb[1].mxu1 }
 0x2b6   : > { %v634_v2 = vadd.f32 %v986_v62, %v633_v1 }
 0x2b7   : > { %v673_v5 = vmax.f32 %v639_v0, 0.0 }
 0x2b8   : > { %v672_v3 = vmax.f32 %v634_v2, 0.0  ;;  %v1115_v4 = vpop.f32.mrb[2].mxu1 }
 0x2b9   : > { %v649_v6 = vadd.f32 %v1115_v4, %v986_v62  ;;  %v643_v7 = vpop.f32.mrb[3].mxu1 }
 0x2ba   : > { %v644_v8 = vadd.f32 %v986_v62, %v643_v7  ;;  %1130 = vmatprep.mubr.msk.f32.mxu1 %vm542_vm1, %v672_v3 }
 0x2bb   : > { %1131 = vmatmul.mubr.msk.f32.vlgmr.msra.gmra.mrb[8].mxu1 %vm542_vm1, %v673_v5  ;;  %v675_v11 = vmax.f32 %v649_v6, 0.0 }
 0x2bc   : > { %v674_v9 = vmax.f32 %v644_v8, 0.0  ;;  %v1118_v10 = vpop.f32.mrb[4].mxu1 }
 0x2bd   : > { %v659_v12 = vadd.f32 %v1118_v10, %v986_v62  ;;  %v653_v13 = vpop.f32.mrb[5].mxu1 }
 0x2be   : > { %v654_v14 = vadd.f32 %v986_v62, %v653_v13  ;;  %1133 = vmatprep.mubr.msk.f32.mxu1 %vm542_vm1, %v674_v9 }
 0x2bf   : > { %1134 = vmatmul.mubr.msk.f32.gmra.mrb[10].mxu1 %vm542_vm1, %v675_v11  ;;  %v677_v17 = vmax.f32 %v659_v12, 0.0 }
 0x2c0   : > { %v676_v15 = vmax.f32 %v654_v14, 0.0  ;;  %v1121_v16 = vpop.f32.mrb[6].mxu1 }
 0x2c1   : > { %v669_v18 = vadd.f32 %v1121_v16, %v986_v62  ;;  %v663_v19 = vpop.f32.mrb[7].mxu1 }
 0x2c2   : > { %v664_v20 = vadd.f32 %v986_v62, %v663_v19  ;;  %1136 = vmatprep.mubr.msk.f32.mxu1 %vm542_vm1, %v676_v15 }
 0x2c3   : > { %1137 = vmatmul.mubr.msk.f32.gmra.mrb[12].mxu1 %vm542_vm1, %v677_v17  ;;  %v679_v22 = vmax.f32 %v669_v18, 0.0 }
 0x2c4   : > { %v678_v21 = vmax.f32 %v664_v20, 0.0 }
 0x2c6   : > { %1139 = vmatprep.mubr.msk.f32.mxu1 %vm542_vm1, %v678_v21 }
 0x2c7   : > { %1140 = vmatmul.mubr.msk.f32.gmra.mrb[14].mxu1 %vm542_vm1, %v679_v22 }
 0x38e   : > { %v1132_v24 = vpop.f32.mrb[8].mxu1 }
 0x38f   : > { %v787_v25 = vadd.f32 %v1132_v24, %v995_v23  ;;  %v781_v26 = vpop.f32.mrb[9].mxu1 }
 0x390   : > { %v782_v27 = vadd.f32 %v995_v23, %v781_v26 }
 0x391   : > { %862 = vrot.lane.b32.xlu0 %v787_v25, %s1323_s13 }
 0x392   : > { %v1135_v28 = vpop.f32.mrb[10].mxu1  ;;  %860 = vrot.lane.b32.xlu1 %v782_v27, %s1323_s13 }
 0x393   : > { %v797_v29 = vadd.f32 %v1135_v28, %v995_v23  ;;  %v791_v30 = vpop.f32.mrb[11].mxu1 }
 0x394   : > { %v792_v31 = vadd.f32 %v995_v23, %v791_v30 }
 0x395   : > { %866 = vrot.lane.b32.xlu0 %v797_v29, %s1323_s13 }
 0x396   : > { %v1138_v32 = vpop.f32.mrb[12].mxu1  ;;  %864 = vrot.lane.b32.xlu1 %v792_v31, %s1323_s13 }
 0x397   : > { %v807_v33 = vadd.f32 %v1138_v32, %v995_v23  ;;  %v801_v34 = vpop.f32.mrb[13].mxu1 }
 0x398   : > { %v802_v35 = vadd.f32 %v995_v23, %v801_v34 }
 0x399   : > { %870 = vrot.lane.b32.xlu0 %v807_v33, %s1323_s13 }
 0x39a   : > { %868 = vrot.lane.b32.xlu1 %v802_v35, %s1323_s13  ;;  %v1141_v36 = vpop.f32.mrb[14].mxu1 }
 0x39b   : > { %v817_v37 = vadd.f32 %v1141_v36, %v995_v23  ;;  %v811_v38 = vpop.f32.mrb[15].mxu1 }
 0x39c   : > { %v812_v39 = vadd.f32 %v995_v23, %v811_v38 }
 0x39d   : > { %874 = vrot.lane.b32.xlu0 %v817_v37, %s1323_s13 }
 0x39e   : > { %872 = vrot.lane.b32.xlu1 %v812_v39, %s1323_s13 }
 0x403   : > { %v863_v48 = vpop.permute.xlu0 %862 }
 0x404   : > { %v886_v49 = vsel %vm884_vm2, %v831_v40, %v863_v48  ;;  %v861_v50 = vpop.permute.xlu1 %860 }
 0x405   : > { %895 = vst.msk [vmem:[%s272_s23 + $0x8] sm:$0xff] %vm893_vm3, %v886_v49  ;;  %v885_v51 = vsel %vm884_vm2, %v829_v41, %v861_v50 }
 0x406   : > { %894 = vst.msk [vmem:[%s272_s23] sm:$0xff] %vm893_vm3, %v885_v51 }
 0x407   : > { %v867_v52 = vpop.permute.xlu0 %866 }
 0x408   : > { %v888_v53 = vsel %vm884_vm2, %v835_v42, %v867_v52  ;;  %v865_v54 = vpop.permute.xlu1 %864 }
 0x409   : > { %897 = vst.msk [vmem:[%s272_s23 + $0x18] sm:$0xff] %vm893_vm3, %v888_v53  ;;  %v887_v55 = vsel %vm884_vm2, %v833_v43, %v865_v54 }
 0x40a   : > { %896 = vst.msk [vmem:[%s272_s23 + $0x10] sm:$0xff] %vm893_vm3, %v887_v55 }
 0x40b   : > { %v871_v56 = vpop.permute.xlu0 %870 }
 0x40c   : > { %v890_v57 = vsel %vm884_vm2, %v839_v44, %v871_v56  ;;  %v869_v58 = vpop.permute.xlu1 %868 }
 0x40d   : > { %899 = vst.msk [vmem:[%s272_s23 + $0x28] sm:$0xff] %vm893_vm3, %v890_v57  ;;  %v889_v59 = vsel %vm884_vm2, %v837_v45, %v869_v58 }
 0x40e   : > { %898 = vst.msk [vmem:[%s272_s23 + $0x20] sm:$0xff] %vm893_vm3, %v889_v59 }
 0x40f   : > { %v875_v60 = vpop.permute.xlu0 %874 }
 0x410   : > { %v892_v61 = vsel %vm884_vm2, %v843_v46, %v875_v60  ;;  %v873_v62 = vpop.permute.xlu1 %872 }
 0x411   : > { %901 = vst.msk [vmem:[%s272_s23 + $0x38] sm:$0xff] %vm893_vm3, %v892_v61  ;;  %v891_v63 = vsel %vm884_vm2, %v841_v47, %v873_v62 }
 0x412   : > { %900 = vst.msk [vmem:[%s272_s23 + $0x30] sm:$0xff] %vm893_vm3, %v891_v63 }
 0x413   : > { %1268 = shalt.err (!%p1265_p3)
}
 0x414   : > { %s1269_s20 = scalar_lea.hbm %s1616_s15, 1024  ;;  %s1273_s23 = scalar_lea.hbm %s1675_s7, 4096 }
 0x415   : > { %p1270_p4 = scmp.ne.s32.totalorder %s1616_s15, %s1269_s20  ;;  %p1274_p9 = scmp.lt.u32.totalorder %s1616_s15, %s1675_s7 }
 0x416   : > { %p1275_p10 = scmp.lt.u32.totalorder %s1273_s23, %s1269_s20  ;;  %p1277_p12 = scmp.lt.u32.totalorder %s1269_s20, %s1616_s15 }
 0x417   : > { %p1271_p7 = pnand %p1270_p4, %p1404_p5 }
 0x418   : > { %p1276_p11 = por %p1275_p10, %p1274_p9 }
 0x419   : > { %p1272_p8 = pneg %p1271_p7 }
 0x41a   : > { %p1278_p13 = por %p1277_p12, %p1276_p11 }
 0x41c   : > { %p1279_p0 = pnand %p1278_p13, %p1272_p8 }
 0x41e   : > { %1282 = shalt.err (!%p1279_p0)
}
 0x41f   : > { %s1325_s14 = smov 128  }
 0x420   : > { %1190 = dma.vmem_to_hbm [thread:$0]  (%p1404_p5), %s1619_s8, 1024, %s1616_s15, %s1626_s28, %s1325_s14, %s1325_s14, %s1323_s13  }
 0x421 PF: > { %p1196_p1 = scmp.ge.s32.totalorder %s1317_s27, 2  ;;  %s931_s16 = sand.u32 1, %s1305_s24  }
 0x422   : > { %s932_s17 = scalar_lea.sflag [#allocation3], %s931_s16 }
 0x423   : > { %p1193_p2 = pnand %p1196_p1, %p1408_p6 }
 0x425   : > { %1300 = dma.done.wait (!%p1193_p2), %s932_s17, 1024  }
 0x426   : > { %1302 = vsyncadd (!%p1193_p2), %s932_s17, 4294966272  ;;  %p17_p3 = scmp.ge.s32.totalorder %s1391_s30, 6   ;;  %s1678_s24 = smov %s1309_s25 }
 0x427   : > { %s1679_s25 = smov %s1313_s26  ;;  %s1680_s26 = smov %s1402_s10 }
 0x428   : > { %s1681_s27 = smov %s1391_s30  ;;  %19 = sbr.rel (!%p17_p3) target bundleno = 3 (0x3), region = 83 }
 0x42f   :  { %937 = vsyncpa [#allocation3], 1 }
 0x430   :  { %939 = vsyncpa [#allocation3 + $0x1], 1 }

</bundles_post_ra>
